<compile_context>
chip_gen: v7x
topology: tpu7x:2x2x1
jax: 0.10.0
libtpu: 0.0.40
codegen_flags: <defaults>
</compile_context>

<pallas_src>
import functools

import jax
import jax.numpy as jnp
from jax import lax
from jax.experimental import pallas as pl
from jax.experimental.pallas import tpu as pltpu

_MATMUL_DTYPE = jnp.bfloat16   # MXU operand dtype (accumulation is always f32)
_CI_PAD = 8                    # lane-pad Cin to 8 so W*Cin == 128 (full vreg)


def _fused_conv_gate_kernel(H, xr_ref, m1_ref, b1_ref, m2_ref, b2_ref, o_ref):
    """v1 = conv1(x); v4 = conv2(v1) + 1; out = (v1 + 3) * clip(v4, 0, 6) / 6.

    xr_ref : (N*H, W*CiP)      input rows, channels fastest on lanes (CiP = 8)
    m*_ref : (W*Cin_k, 3*W*Co) kh-stacked banded conv weights (width
                               zero-padding folded into the band structure)
    b*_ref : (1, W*Co)         bias rows (b2 already carries the "+1")
    o_ref  : (N*H, W*Co)       lane-dense output rows (row-major == NHWC)
    """
    NH, WCo = o_ref.shape

    # Per-row height position, shared by both convs.  H is a power of two here
    # so the mod lowers to a cheap bitwise-and on the VPU.
    hpos = lax.broadcasted_iota(jnp.int32, (NH, WCo), 0) % H
    not_top = hpos != 0          # drop the kh=0 tap on the first row of each image
    not_bot = hpos != H - 1      # drop the kh=2 tap on the last row of each image

    def conv(rows, m_ref, b_ref):
        # Single MXU matmul covering all three kh taps: (NH, K) @ (K, 3*WCo).
        y = jnp.dot(rows, m_ref[...], preferred_element_type=jnp.float32)
        y0 = y[:, :WCo]            # tap kh=0 -> contribution of row h-1
        y1 = y[:, WCo:2 * WCo]     # tap kh=1 -> row h
        y2 = y[:, 2 * WCo:]        # tap kh=2 -> row h+1
        # Height shift applied to the *outputs* via sublane rolls (XLU slot,
        # nearly free) + boundary masks; replaces the old H-padded scratch
        # buffers, zero-fills and shifted-slice copies.
        out = y1 + jnp.where(not_top, pltpu.roll(y0, shift=1, axis=0), 0.0)
        out = out + jnp.where(not_bot, pltpu.roll(y2, shift=NH - 1, axis=0), 0.0)
        return out + b_ref[...]    # bias once, off the matmul critical path

    v1 = conv(xr_ref[...], m1_ref, b1_ref)                 # f32 (NH, WCo)
    v4 = conv(v1.astype(m2_ref.dtype), m2_ref, b2_ref)     # conv2(v1) + b2 + 1
    v2 = v1 + 3.0                                          # gate math in f32
    v6 = jnp.clip(v4, 0.0, 6.0)
    o_ref[...] = (v2 * v6) * (1.0 / 6.0)                   # multiply, not divide


def _banded_stacked_weight(w_oihw, W, ci_pad):
    """OIHW (Co, Ci, 3, 3) -> (W*ci_pad, 3*W*Co) kh-stacked banded matrix.

    M_kh[j*ci_pad + ci, w*Co + co] = w[co, ci, kh, j - w + 1] on |j - w| <= 1,
    zero elsewhere (width zero-padding is implicit); the three kh blocks are
    concatenated along the columns so one matmul covers all taps.
    """
    Co, Ci, KH, KW = w_oihw.shape
    wt = jnp.transpose(w_oihw, (2, 3, 1, 0)).astype(jnp.float32)   # (KH, KW, Ci, Co)
    if ci_pad > Ci:
        wt = jnp.pad(wt, ((0, 0), (0, 0), (0, ci_pad - Ci), (0, 0)))
    band = (jnp.arange(W)[None, :, None] ==
            jnp.arange(W)[None, None, :] + jnp.arange(KW)[:, None, None] - 1
            ).astype(jnp.float32)                                  # (KW, Wj, Ww)
    M = jnp.einsum('kjw,hkio->hjiwo', band, wt)                    # (KH, Wj, CiP, Ww, Co)
    M = M.reshape(KH, W * ci_pad, W * Co)
    return jnp.concatenate([M[0], M[1], M[2]], axis=1)             # (W*CiP, 3*W*Co)


def prepare_params(w1, b1, w2, b2, W):
    """Heavy weight transformation, hoisted out of the per-call jit path."""
    Co = w1.shape[0]
    m1 = _banded_stacked_weight(w1, W, _CI_PAD).astype(_MATMUL_DTYPE)
    m2 = _banded_stacked_weight(w2, W, Co).astype(_MATMUL_DTYPE)
    b1row = jnp.tile(b1.astype(jnp.float32), W).reshape(1, W * Co)
    b2row = jnp.tile(b2.astype(jnp.float32) + 1.0, W).reshape(1, W * Co)  # fold "+1"
    return m1, b1row, m2, b2row


@jax.jit
def model_forward(x_nchw, m1, b1row, m2, b2row):
    """x_nchw: (N, Cin, H, W); m*/b*row: outputs of prepare_params()."""
    N, Ci, H, W = x_nchw.shape
    Co = b1row.shape[-1] // W

    # NCHW -> (N*H, W*CiP): channels fastest on lanes, Cin zero-padded to 8 so
    # every row is a full 128-lane vreg (row-major identical to padded NHWC).
    xr = jnp.transpose(x_nchw, (0, 2, 3, 1))
    xr = jnp.pad(xr, ((0, 0), (0, 0), (0, 0), (0, _CI_PAD - Ci)))
    xr = xr.reshape(N * H, W * _CI_PAD).astype(_MATMUL_DTYPE)

    vmem = pl.BlockSpec(memory_space=pltpu.MemorySpace.VMEM)
    out_rows = pl.pallas_call(
        functools.partial(_fused_conv_gate_kernel, H),
        out_shape=jax.ShapeDtypeStruct((N * H, W * Co), jnp.float32),
        in_specs=[vmem] * 5,
        out_specs=vmem,
    )(xr, m1, b1row, m2, b2row)

    # (N*H, W*Co) rows == NHWC row-major.  If the consumer tolerates NHWC,
    # return out_rows.reshape(N, H, W, Co) directly and skip this transpose.
    return jnp.transpose(out_rows.reshape(N, H, W, Co), (0, 3, 1, 2))


def reference_forward(x, w1, b1, w2, b2):
    dn = ("NCHW", "OIHW", "NCHW")
    pad = ((1, 1), (1, 1))
    v1 = lax.conv_general_dilated(x, w1, (1, 1), pad,
                                  dimension_numbers=dn) + b1[None, :, None, None]
    v2 = v1 + 3.0
    v3 = lax.conv_general_dilated(v1, w2, (1, 1), pad,
                                  dimension_numbers=dn) + b2[None, :, None, None]
    v4 = v3 + 1.0
    v6 = jnp.clip(v4, 0.0, 6.0)
    return v2 * v6 / 6.0


if __name__ == "__main__":
    key = jax.random.PRNGKey(0)
    kx, kw1, kb1, kw2, kb2 = jax.random.split(key, 5)

    N, Cin, H, W = 2, 3, 16, 16
    Cmid = 8

    x = jax.random.normal(kx, (N, Cin, H, W), jnp.float32)

    fan1 = float(Cin * 3 * 3)
    w1 = jax.random.uniform(kw1, (Cmid, Cin, 3, 3), jnp.float32, -1.0, 1.0) / jnp.sqrt(fan1)
    b1 = jax.random.uniform(kb1, (Cmid,), jnp.float32, -1.0, 1.0) / jnp.sqrt(fan1)
    # TODO(synk): stand-in 8->8 weight for the module's ill-typed self.conv reuse.
    fan2 = float(Cmid * 3 * 3)
    w2 = jax.random.uniform(kw2, (Cmid, Cmid, 3, 3), jnp.float32, -1.0, 1.0) / jnp.sqrt(fan2)
    b2 = jax.random.uniform(kb2, (Cmid,), jnp.float32, -1.0, 1.0) / jnp.sqrt(fan2)

    # One-time weight preparation, outside the per-call jit path.
    m1, b1row, m2, b2row = prepare_params(w1, b1, w2, b2, W)

    out = jax.block_until_ready(model_forward(x, m1, b1row, m2, b2row))
    ref = jax.block_until_ready(reference_forward(x, w1, b1, w2, b2))

    assert out.shape == (N, Cmid, H, W), out.shape
    err = float(jnp.max(jnp.abs(out - ref)))
    # bf16 matmul operands (f32 accumulation) give ~1e-2 max deviation vs. the
    # pure-f32 reference; switch _MATMUL_DTYPE to jnp.float32 for <1e-5.
    tol = 5e-2 if _MATMUL_DTYPE == jnp.bfloat16 else 1e-3
    assert err < tol, err

    print("KERNEL_OK")
</pallas_src>

<mosaic_0001>
module attributes {stable_mosaic.version = 11 : i64} {
  func.func @_fused_conv_gate_kernel(%arg0: memref<32x128xbf16, #tpu.memory_space<vmem>>, %arg1: memref<128x384xbf16, #tpu.memory_space<vmem>>, %arg2: memref<1x128xf32, #tpu.memory_space<vmem>>, %arg3: memref<128x384xbf16, #tpu.memory_space<vmem>>, %arg4: memref<1x128xf32, #tpu.memory_space<vmem>>, %arg5: memref<32x128xf32, #tpu.memory_space<vmem>>) attributes {dimension_semantics = [], scalar_prefetch = 0 : i64, scratch_operands = 0 : i64, tpu.core_type = #tpu.core_type<tc>} {
    %0 = tpu.iota {dimensions = array<i32: 0>} : vector<32x128xi32>
    %c16_i32 = arith.constant 16 : i32
    %c0_i32 = arith.constant 0 : i32
    %1 = arith.cmpi eq, %c16_i32, %c0_i32 : i32
    %c1_i32 = arith.constant 1 : i32
    %2 = arith.select %1, %c1_i32, %c16_i32 : i32
    %3 = vector.broadcast %2 : i32 to vector<32x128xi32>
    %4 = arith.remsi %0, %3 : vector<32x128xi32>
    %c0_i32_0 = arith.constant 0 : i32
    %5 = vector.broadcast %c0_i32_0 : i32 to vector<32x128xi32>
    %6 = arith.cmpi ne, %4, %5 : vector<32x128xi32>
    %c0_i32_1 = arith.constant 0 : i32
    %7 = vector.broadcast %c0_i32_1 : i32 to vector<32x128xi32>
    %8 = arith.cmpi slt, %4, %7 : vector<32x128xi32>
    %c0_i32_2 = arith.constant 0 : i32
    %9 = arith.cmpi slt, %2, %c0_i32_2 : i32
    %10 = vector.broadcast %9 : i1 to vector<32x128xi1>
    %11 = vector.broadcast %10 : vector<32x128xi1> to vector<32x128xi1>
    %12 = arith.xori %8, %11 : vector<32x128xi1>
    %13 = arith.andi %12, %6 : vector<32x128xi1>
    %14 = vector.broadcast %2 : i32 to vector<32x128xi32>
    %15 = arith.addi %4, %14 : vector<32x128xi32>
    %16 = arith.select %13, %15, %4 : vector<32x128xi1>, vector<32x128xi32>
    %c0_i32_3 = arith.constant 0 : i32
    %17 = vector.broadcast %c0_i32_3 : i32 to vector<32x128xi32>
    %18 = arith.cmpi ne, %16, %17 : vector<32x128xi32>
    %c15_i32 = arith.constant 15 : i32
    %19 = vector.broadcast %c15_i32 : i32 to vector<32x128xi32>
    %20 = arith.cmpi ne, %16, %19 : vector<32x128xi32>
    %c0 = arith.constant 0 : index
    %c0_4 = arith.constant 0 : index
    %21 = vector.load %arg0[%c0, %c0_4] : memref<32x128xbf16, #tpu.memory_space<vmem>>, vector<32x128xbf16>
    %c0_5 = arith.constant 0 : index
    %c0_6 = arith.constant 0 : index
    %22 = vector.load %arg1[%c0_5, %c0_6] : memref<128x384xbf16, #tpu.memory_space<vmem>>, vector<128x384xbf16>
    %cst = arith.constant dense<0.000000e+00> : vector<32x384xf32>
    %23 = tpu.matmul %21, %22, %cst {dimension_numbers = #tpu.dot_dimension_numbers<[1], [0], [0], [1], [0, 0, 1, 1], [], []>} : vector<32x128xbf16>, vector<128x384xbf16>, vector<32x384xf32> -> vector<32x384xf32>
    %24 = vector.extract_strided_slice %23 {offsets = [0, 0], sizes = [32, 128], strides = [1, 1]} : vector<32x384xf32> to vector<32x128xf32>
    %25 = vector.extract_strided_slice %23 {offsets = [0, 128], sizes = [32, 128], strides = [1, 1]} : vector<32x384xf32> to vector<32x128xf32>
    %26 = vector.extract_strided_slice %23 {offsets = [0, 256], sizes = [32, 128], strides = [1, 1]} : vector<32x384xf32> to vector<32x128xf32>
    %c1_i32_7 = arith.constant 1 : i32
    %27 = tpu.dynamic_rotate %24 by %c1_i32_7 dim 0 : vector<32x128xf32>, i32 -> vector<32x128xf32>
    %cst_8 = arith.constant 0.000000e+00 : f32
    %28 = vector.broadcast %cst_8 : f32 to vector<32x128xf32>
    %29 = arith.select %18, %27, %28 : vector<32x128xi1>, vector<32x128xf32>
    %30 = arith.addf %25, %29 : vector<32x128xf32>
    %c31_i32 = arith.constant 31 : i32
    %31 = tpu.dynamic_rotate %26 by %c31_i32 dim 0 : vector<32x128xf32>, i32 -> vector<32x128xf32>
    %cst_9 = arith.constant 0.000000e+00 : f32
    %32 = vector.broadcast %cst_9 : f32 to vector<32x128xf32>
    %33 = arith.select %20, %31, %32 : vector<32x128xi1>, vector<32x128xf32>
    %34 = arith.addf %30, %33 : vector<32x128xf32>
    %c0_10 = arith.constant 0 : index
    %c0_11 = arith.constant 0 : index
    %35 = vector.load %arg2[%c0_10, %c0_11] : memref<1x128xf32, #tpu.memory_space<vmem>>, vector<1x128xf32>
    %36 = vector.broadcast %35 : vector<1x128xf32> to vector<32x128xf32>
    %37 = arith.addf %34, %36 : vector<32x128xf32>
    %38 = arith.truncf %37 : vector<32x128xf32> to vector<32x128xbf16>
    %c0_12 = arith.constant 0 : index
    %c0_13 = arith.constant 0 : index
    %39 = vector.load %arg3[%c0_12, %c0_13] : memref<128x384xbf16, #tpu.memory_space<vmem>>, vector<128x384xbf16>
    %cst_14 = arith.constant dense<0.000000e+00> : vector<32x384xf32>
    %40 = tpu.matmul %38, %39, %cst_14 {dimension_numbers = #tpu.dot_dimension_numbers<[1], [0], [0], [1], [0, 0, 1, 1], [], []>} : vector<32x128xbf16>, vector<128x384xbf16>, vector<32x384xf32> -> vector<32x384xf32>
    %41 = vector.extract_strided_slice %40 {offsets = [0, 0], sizes = [32, 128], strides = [1, 1]} : vector<32x384xf32> to vector<32x128xf32>
    %42 = vector.extract_strided_slice %40 {offsets = [0, 128], sizes = [32, 128], strides = [1, 1]} : vector<32x384xf32> to vector<32x128xf32>
    %43 = vector.extract_strided_slice %40 {offsets = [0, 256], sizes = [32, 128], strides = [1, 1]} : vector<32x384xf32> to vector<32x128xf32>
    %c1_i32_15 = arith.constant 1 : i32
    %44 = tpu.dynamic_rotate %41 by %c1_i32_15 dim 0 : vector<32x128xf32>, i32 -> vector<32x128xf32>
    %cst_16 = arith.constant 0.000000e+00 : f32
    %45 = vector.broadcast %cst_16 : f32 to vector<32x128xf32>
    %46 = arith.select %18, %44, %45 : vector<32x128xi1>, vector<32x128xf32>
    %47 = arith.addf %42, %46 : vector<32x128xf32>
    %c31_i32_17 = arith.constant 31 : i32
    %48 = tpu.dynamic_rotate %43 by %c31_i32_17 dim 0 : vector<32x128xf32>, i32 -> vector<32x128xf32>
    %cst_18 = arith.constant 0.000000e+00 : f32
    %49 = vector.broadcast %cst_18 : f32 to vector<32x128xf32>
    %50 = arith.select %20, %48, %49 : vector<32x128xi1>, vector<32x128xf32>
    %51 = arith.addf %47, %50 : vector<32x128xf32>
    %c0_19 = arith.constant 0 : index
    %c0_20 = arith.constant 0 : index
    %52 = vector.load %arg4[%c0_19, %c0_20] : memref<1x128xf32, #tpu.memory_space<vmem>>, vector<1x128xf32>
    %53 = vector.broadcast %52 : vector<1x128xf32> to vector<32x128xf32>
    %54 = arith.addf %51, %53 : vector<32x128xf32>
    %cst_21 = arith.constant 3.000000e+00 : f32
    %55 = vector.broadcast %cst_21 : f32 to vector<32x128xf32>
    %56 = arith.addf %37, %55 : vector<32x128xf32>
    %cst_22 = arith.constant 0.000000e+00 : f32
    %cst_23 = arith.constant 6.000000e+00 : f32
    %57 = vector.broadcast %cst_22 : f32 to vector<32x128xf32>
    %58 = arith.maximumf %57, %54 : vector<32x128xf32>
    %59 = vector.broadcast %cst_23 : f32 to vector<32x128xf32>
    %60 = arith.minimumf %59, %58 : vector<32x128xf32>
    %61 = arith.mulf %56, %60 : vector<32x128xf32>
    %cst_24 = arith.constant 0.166666672 : f32
    %62 = vector.broadcast %cst_24 : f32 to vector<32x128xf32>
    %63 = arith.mulf %61, %62 : vector<32x128xf32>
    %c0_25 = arith.constant 0 : index
    %c0_26 = arith.constant 0 : index
    %64 = vector.load %arg5[%c0_25, %c0_26] : memref<32x128xf32, #tpu.memory_space<vmem>>, vector<32x128xf32>
    tpu.vector_store %arg5[%c0_25, %c0_26], %63 {strides = array<i32>} : memref<32x128xf32, #tpu.memory_space<vmem>>, vector<32x128xf32>,
    return
  }
}

</mosaic_0001>

<bundles_post_ra>
// kernel: model_forward.1
= control target key start
LH: loop header
LB: loop body
LE: loop exit
PB: predicated region body
PF: predicated region fallthrough
CT: control target
= control target key end

     0   :  { %v919_v1 = vmov 0   ;;  %v21_v51 = vlaneseq  ;;  %s1206_s1 = inlined_call_operand.vmem [shape: bf16[128,384], index: 1, kind: input, shape index: {}]   ;;  %s1207_s0 = inlined_call_operand.vmem [shape: bf16[32,128], index: 0, kind: input, shape index: {}]   ;;  %s1208_s3 = inlined_call_operand.vmem [shape: bf16[128,384], index: 3, kind: input, shape index: {}]   ;;  %s1209_s2 = inlined_call_operand.vmem [shape: f32[1,128], index: 2, kind: input, shape index: {}]   ;;  %s1210_s4 = inlined_call_operand.vmem [shape: f32[1,128], index: 4, kind: input, shape index: {}]   ;;  %s1211_s5 = inlined_call_operand.vmem [shape: f32[32,128], index: 5, kind: output, shape index: {}]  }
   0x1   :  { %v853_v0 = vld [vmem:[%s1206_s1 + $0x4] ss:$12 sps:$4 sm:$0xff]   ;;  %290 = vmatprep.mubr.bf16.mxu0 %v919_v1  ;;  %v855_v2 = vld [vmem:[%s1206_s1 + $0x8] ss:$12 sps:$4 sm:$0xff]   ;;  %v856_v3 = vld [vmem:[%s1206_s1] ss:$12 sps:$4 sm:$0xff]  }
   0x2   :  { %258 = vmatprep.subr.bf16.mxu0 %v853_v0  ;;  %812 = vmatprep.subr.bf16.mxu1 %v855_v2  ;;  %v857_v4 = vld [vmem:[%s1206_s1 + $0x1c] ss:$12 sps:$4 sm:$0xff]   ;;  %v859_v5 = vld [vmem:[%s1206_s1 + $0x20] ss:$12 sps:$4 sm:$0xff]   ;;  %v860_v6 = vld [vmem:[%s1206_s1 + $0x18] ss:$12 sps:$4 sm:$0xff]  }
   0x3   :  { %259 = vmatpush1.bf16.msra.mxu0 %v856_v3  ;;  %813 = vmatpush3.bf16.msra.mxu1 %v855_v2  ;;  %v861_v7 = vld [vmem:[%s1206_s1 + $0x34] ss:$12 sps:$4 sm:$0xff]   ;;  %v863_v8 = vld [vmem:[%s1206_s1 + $0x38] ss:$12 sps:$4 sm:$0xff]   ;;  %v864_v9 = vld [vmem:[%s1206_s1 + $0x30] ss:$12 sps:$4 sm:$0xff]  }
   0x4   :  { %260 = vmatprep.subr.bf16.mxu0 %v857_v4  ;;  %814 = vmatprep.subr.bf16.mxu1 %v859_v5  ;;  %v865_v10 = vld [vmem:[%s1206_s1 + $0x4c] ss:$12 sps:$4 sm:$0xff]   ;;  %v867_v11 = vld [vmem:[%s1206_s1 + $0x50] ss:$12 sps:$4 sm:$0xff]   ;;  %v868_v12 = vld [vmem:[%s1206_s1 + $0x48] ss:$12 sps:$4 sm:$0xff]  }
   0x5   :  { %v869_v13 = vld [vmem:[%s1206_s1 + $0x64] ss:$12 sps:$4 sm:$0xff]   ;;  %v871_v14 = vld [vmem:[%s1206_s1 + $0x68] ss:$12 sps:$4 sm:$0xff]   ;;  %v872_v15 = vld [vmem:[%s1206_s1 + $0x60] ss:$12 sps:$4 sm:$0xff]  }
   0x6   :  { %v873_v16 = vld [vmem:[%s1206_s1 + $0x7c] ss:$12 sps:$4 sm:$0xff]   ;;  %v875_v17 = vld [vmem:[%s1206_s1 + $0x80] ss:$12 sps:$4 sm:$0xff]   ;;  %v876_v19 = vld [vmem:[%s1206_s1 + $0x78] ss:$12 sps:$4 sm:$0xff]  }
   0x7   :  { %261 = vmatpush1.bf16.msra.mxu0 %v860_v6  ;;  %815 = vmatpush3.bf16.msra.mxu1 %v859_v5  ;;  %v885_v18 = vld [vmem:[%s1207_s0] sm:$0xff]   ;;  %v880_v22 = vld [vmem:[%s1206_s1 + $0x90] ss:$12 sps:$4 sm:$0xff]   ;;  %v881_v23 = vld [vmem:[%s1206_s1 + $0xac] ss:$12 sps:$4 sm:$0xff]   ;;  %v1103_v52 = vshrl.u32 %v21_v51, 7 }
   0x8   :  { %262 = vmatprep.subr.bf16.mxu0 %v861_v7  ;;  %816 = vmatprep.subr.bf16.mxu1 %v863_v8  ;;  %v877_v20 = vld [vmem:[%s1206_s1 + $0x94] ss:$12 sps:$4 sm:$0xff]   ;;  %v879_v21 = vld [vmem:[%s1206_s1 + $0x98] ss:$12 sps:$4 sm:$0xff]   ;;  %v883_v24 = vld [vmem:[%s1206_s1 + $0xb0] ss:$12 sps:$4 sm:$0xff]  }
   0x9   :  { %828 = vmatprep.mubr.bf16.mxu1 %v885_v18  ;;  %v884_v25 = vld [vmem:[%s1206_s1 + $0xa8] ss:$12 sps:$4 sm:$0xff]   ;;  %v889_v26 = vld [vmem:[%s1208_s3 + $0x4] ss:$12 sps:$4 sm:$0xff]   ;;  %v887_v29 = vld [vmem:[%s1208_s3] ss:$12 sps:$4 sm:$0xff]  }
   0xa   :  { %v890_v27 = vld [vmem:[%s1208_s3 + $0x8] ss:$12 sps:$4 sm:$0xff]   ;;  %v894_v31 = vld [vmem:[%s1208_s3 + $0x20] ss:$12 sps:$4 sm:$0xff]   ;;  %v891_v32 = vld [vmem:[%s1208_s3 + $0x18] ss:$12 sps:$4 sm:$0xff]  }
   0xb   :  { %263 = vmatpush1.bf16.msra.mxu0 %v864_v9  ;;  %817 = vmatpush3.bf16.msra.mxu1 %v863_v8  ;;  %v886_v28 = vld [vmem:[%s1207_s0 + $0x8] sm:$0xff]   ;;  %v897_v33 = vld [vmem:[%s1208_s3 + $0x34] ss:$12 sps:$4 sm:$0xff]   ;;  %v895_v34 = vld [vmem:[%s1208_s3 + $0x30] ss:$12 sps:$4 sm:$0xff]   ;;  %v23_v53 = vadd.s32 8, %v1103_v52 }
   0xc   :  { %264 = vmatprep.subr.bf16.mxu0 %v865_v10  ;;  %818 = vmatprep.subr.bf16.mxu1 %v867_v11  ;;  %v893_v30 = vld [vmem:[%s1208_s3 + $0x1c] ss:$12 sps:$4 sm:$0xff]   ;;  %v898_v35 = vld [vmem:[%s1208_s3 + $0x38] ss:$12 sps:$4 sm:$0xff]   ;;  %v903_v40 = vld [vmem:[%s1208_s3 + $0x60] ss:$12 sps:$4 sm:$0xff]  }
   0xd   :  { %v901_v36 = vld [vmem:[%s1208_s3 + $0x4c] ss:$12 sps:$4 sm:$0xff]   ;;  %v899_v37 = vld [vmem:[%s1208_s3 + $0x48] ss:$12 sps:$4 sm:$0xff]   ;;  %v902_v38 = vld [vmem:[%s1208_s3 + $0x50] ss:$12 sps:$4 sm:$0xff]  }
   0xe   :  { %v905_v39 = vld [vmem:[%s1208_s3 + $0x64] ss:$12 sps:$4 sm:$0xff]   ;;  %v906_v41 = vld [vmem:[%s1208_s3 + $0x68] ss:$12 sps:$4 sm:$0xff]   ;;  %v910_v44 = vld [vmem:[%s1208_s3 + $0x80] ss:$12 sps:$4 sm:$0xff]  }
   0xf   :  { %265 = vmatpush1.bf16.msra.mxu0 %v868_v12  ;;  %819 = vmatpush3.bf16.msra.mxu1 %v867_v11  ;;  %v909_v42 = vld [vmem:[%s1208_s3 + $0x7c] ss:$12 sps:$4 sm:$0xff]   ;;  %v907_v43 = vld [vmem:[%s1208_s3 + $0x78] ss:$12 sps:$4 sm:$0xff]   ;;  %v913_v45 = vld [vmem:[%s1208_s3 + $0x94] ss:$12 sps:$4 sm:$0xff]  }
  0x10   :  { %266 = vmatprep.subr.bf16.mxu0 %v869_v13  ;;  %820 = vmatprep.subr.bf16.mxu1 %v871_v14  ;;  %v911_v46 = vld [vmem:[%s1208_s3 + $0x90] ss:$12 sps:$4 sm:$0xff]   ;;  %v914_v47 = vld [vmem:[%s1208_s3 + $0x98] ss:$12 sps:$4 sm:$0xff]   ;;  %v915_v49 = vld [vmem:[%s1208_s3 + $0xa8] ss:$12 sps:$4 sm:$0xff]  }
  0x11   :  { %v917_v48 = vld [vmem:[%s1208_s3 + $0xac] ss:$12 sps:$4 sm:$0xff]   ;;  %v918_v50 = vld [vmem:[%s1208_s3 + $0xb0] ss:$12 sps:$4 sm:$0xff]   ;;  %v37_v56 = vand.u32 15, %v23_v53  ;;  %v24_v59 = vadd.s32 16, %v1103_v52 }
  0x12   :  { %vm364_vm0 = vcmp.lt.s32.totalorder %v1103_v52, 1  ;;  %vm381_vm1 = vcmp.lt.s32.totalorder %v1103_v52, 7  ;;  %v25_v8 = vadd.s32 24, %v1103_v52 }
  0x13   :  { %267 = vmatpush1.bf16.msra.mxu0 %v872_v15  ;;  %821 = vmatpush3.bf16.msra.mxu1 %v871_v14  ;;  %vm1109_vm2 = vcmp.ne.s32.totalorder %v37_v56, 15  ;;  %v44_v10 = vand.u32 15, %v24_v59 }
  0x14   :  { %268 = vmatprep.subr.bf16.mxu0 %v873_v16  ;;  %822 = vmatprep.subr.bf16.mxu1 %v875_v17 }
  0x15   :  { %vm1127_vm3 = vcmp.ne.s32.totalorder %v44_v10, 0 }
  0x17   :  { %269 = vmatpush1.bf16.msra.mxu0 %v876_v19  ;;  %823 = vmatpush3.bf16.msra.mxu1 %v875_v17  ;;  %v30_v17 = vand.u32 15, %v1103_v52 }
  0x18   :  { %270 = vmatprep.subr.bf16.mxu0 %v877_v20  ;;  %824 = vmatprep.subr.bf16.mxu1 %v879_v21  ;;  %v51_v20 = vand.u32 15, %v25_v8 }
  0x19   :  { %vm1133_vm4 = vcmp.ne.s32.totalorder %v30_v17, 0 }
  0x1a   :  { %vm1139_vm5 = vcmp.ne.s32.totalorder %v51_v20, 15 }
  0x1b   :  { %271 = vmatpush1.bf16.msra.mxu0 %v880_v22  ;;  %825 = vmatpush3.bf16.msra.mxu1 %v879_v21 }
  0x1c   :  { %272 = vmatprep.subr.bf16.mxu0 %v881_v23  ;;  %826 = vmatprep.subr.bf16.mxu1 %v883_v24 }
  0x1f   :  { %273 = vmatpush1.bf16.msra.mxu0 %v884_v25  ;;  %827 = vmatpush3.bf16.msra.mxu1 %v883_v24 }
  0x20   :  { %567 = vmatprep.subr.bf16.mxu0 %v889_v26  ;;  %832 = vmatprep.subr.bf16.mxu1 %v890_v27 }
  0x22   :  { %291 = vmatmul.mubr.bf16.vlgmr.msra.gmra.mrb[0].mxu0 %v885_v18  ;;  %829 = vmatmul.mubr.bf16.vlgmr.msra.gmra.mrb[0].mxu1 %v886_v28 }
  0x23   :  { %300 = vmatprep.mubr.bf16.mxu0 %v919_v1  ;;  %568 = vmatpush1.bf16.msra.mxu0 %v887_v29 }
  0x24   :  { %833 = vmatpush3.bf16.msra.mxu1 %v890_v27  ;;  %569 = vmatprep.subr.bf16.mxu0 %v893_v30 }
  0x25   :  { %834 = vmatprep.subr.bf16.mxu1 %v894_v31 }
  0x27   :  { %570 = vmatpush1.bf16.msra.mxu0 %v891_v32 }
  0x28   :  { %835 = vmatpush3.bf16.msra.mxu1 %v894_v31  ;;  %571 = vmatprep.subr.bf16.mxu0 %v897_v33 }
  0x29   :  { %836 = vmatprep.subr.bf16.mxu1 %v898_v35 }
  0x2a   :  { %301 = vmatmul.mubr.bf16.gmra.mrb[4].mxu0 %v886_v28 }
  0x2b   :  { %572 = vmatpush1.bf16.msra.mxu0 %v895_v34  ;;  %599 = vmatprep.mubr.bf16.mxu0 %v919_v1 }
  0x2c   :  { %837 = vmatpush3.bf16.msra.mxu1 %v898_v35  ;;  %573 = vmatprep.subr.bf16.mxu0 %v901_v36 }
  0x2d   :  { %838 = vmatprep.subr.bf16.mxu1 %v902_v38 }
  0x2f   :  { %574 = vmatpush1.bf16.msra.mxu0 %v899_v37 }
  0x30   :  { %839 = vmatpush3.bf16.msra.mxu1 %v902_v38  ;;  %575 = vmatprep.subr.bf16.mxu0 %v905_v39  ;;  %v766_v39 = vld [vmem:[%s1209_s2] ss:$0 sm:$0xff] }
  0x31   :  { %840 = vmatprep.subr.bf16.mxu1 %v906_v41 }
  0x33   :  { %576 = vmatpush1.bf16.msra.mxu0 %v903_v40 }
  0x34   :  { %841 = vmatpush3.bf16.msra.mxu1 %v906_v41  ;;  %577 = vmatprep.subr.bf16.mxu0 %v909_v42 }
  0x35   :  { %842 = vmatprep.subr.bf16.mxu1 %v910_v44 }
  0x37   :  { %578 = vmatpush1.bf16.msra.mxu0 %v907_v43 }
  0x38   :  { %843 = vmatpush3.bf16.msra.mxu1 %v910_v44  ;;  %579 = vmatprep.subr.bf16.mxu0 %v913_v45 }
  0x39   :  { %844 = vmatprep.subr.bf16.mxu1 %v914_v47 }
  0x3b   :  { %580 = vmatpush1.bf16.msra.mxu0 %v911_v46 }
  0x3c   :  { %845 = vmatpush3.bf16.msra.mxu1 %v914_v47  ;;  %581 = vmatprep.subr.bf16.mxu0 %v917_v48 }
  0x3d   :  { %846 = vmatprep.subr.bf16.mxu1 %v918_v50 }
  0x3f   :  { %582 = vmatpush1.bf16.msra.mxu0 %v915_v49 }
  0x40   :  { %847 = vmatpush3.bf16.msra.mxu1 %v918_v50 }
  0xf5   :  { %v292_v54 = vpop.f32.mrb[0].mxu0  ;;  %v830_v55 = vpop.f32.mrb[0].mxu1 }
  0xf6   :  { %v294_v57 = vpop.f32.mrb[1].mxu0  ;;  %v345_v58 = vpop.f32.mrb[1].mxu1  ;;  %v379_v60 = vrot.slane %v830_v55, 1  ;;  %v360_v0 = vrot.slane %v292_v54, 7 }
  0xf7   :  { %v377_v61 = vrot.slane %v345_v58, 1  ;;  %v296_v62 = vpop.f32.mrb[2].mxu0  ;;  %v831_v63 = vpop.f32.mrb[2].mxu1 }
  0xf8   :  { %v361_v2 = vrot.slane %v296_v62, 7  ;;  %v380_v3 = vrot.slane %v831_v63, 1  ;;  %v298_v4 = vpop.f32.mrb[3].mxu0  ;;  %v348_v5 = vpop.f32.mrb[3].mxu1 }
  0xf9   :  { %v378_v7 = vrot.slane %v348_v5, 1 }
  0xfa   :  { %v367_v9 = vsel %vm364_vm0, %v360_v0, %v361_v2  ;;  %v382_v11 = vsel %vm381_vm1, %v379_v60, %v380_v3  ;;  %v385_v12 = vsel %vm381_vm1, %v380_v3, %v377_v61 }
  0xfb   :  { %v374_v13 = vadd.f32 %v367_v9, %v298_v4  ;;  %v383_v14 = vsel %vm381_vm1, %v378_v7, %v379_v60  ;;  %v384_v15 = vsel %vm381_vm1, %v377_v61, %v378_v7  ;;  %v389_v38 = vsel %vm1139_vm5, %v385_v12, 0.0  ;;  %v791_v7 = vld [vmem:[%s1210_s4] ss:$0 sm:$0xff] }
  0xfc   :  { %v387_v16 = vsel %vm1109_vm2, %v383_v14, 0.0 }
  0xfd   :  { %v391_v18 = vadd.f32 %v387_v16, %v374_v13  ;;  %v302_v19 = vpop.f32.mrb[4].mxu0 }
  0xfe   :  { %v362_v21 = vrot.slane %v302_v19, 7  ;;  %v304_v23 = vpop.f32.mrb[5].mxu0 }
  0xff   :  { %v306_v24 = vpop.f32.mrb[6].mxu0  ;;  %v402_v44 = vadd.f32 %v766_v39, %v391_v18 }
 0x100   :  { %v366_v25 = vsel %vm364_vm0, %v361_v2, %v362_v21  ;;  %v363_v27 = vrot.slane %v306_v24, 7  ;;  %v308_v28 = vpop.f32.mrb[7].mxu0 }
 0x101   :  { %v371_v29 = vsel %vm1127_vm3, %v366_v25, 0.0 }
 0x102   :  { %v375_v31 = vadd.f32 %v371_v29, %v304_v23  ;;  %v368_v32 = vsel %vm364_vm0, %v363_v27, %v360_v0  ;;  %v365_v33 = vsel %vm364_vm0, %v362_v21, %v363_v27  ;;  %v713_v21 = vadd.f32 3.0, %v402_v44 }
 0x103   :  { %v369_v34 = vsel %vm1133_vm4, %v368_v32, 0.0  ;;  %v376_v35 = vadd.f32 %v365_v33, %v308_v28 }
 0x104   :  { %v392_v36 = vadd.f32 %v382_v11, %v375_v31  ;;  %v373_v37 = vadd.f32 %v369_v34, %v294_v57 }
 0x105   :  { %v393_v40 = vadd.f32 %v389_v38, %v376_v35 }
 0x106   :  { %v1154_v41 = vadd.f32 %v766_v39, %v392_v36  ;;  %v390_v42 = vadd.f32 %v384_v15, %v373_v37 }
 0x107   :  { %v1156_v43 = vadd.f32 %v766_v39, %v393_v40 }
 0x108   :  { %v1158_v45 = vadd.f32 %v766_v39, %v390_v42  ;;  %v714_v38 = vadd.f32 3.0, %v1154_v41 }
 0x109   :  { %v406_v46 = vpack.c.bf16 %v1156_v43, %v1154_v41  ;;  %v715_v30 = vadd.f32 3.0, %v1156_v43 }
 0x10a   :  { %v405_v47 = vpack.c.bf16 %v402_v44, %v1158_v45  ;;  %v712_v42 = vadd.f32 3.0, %v1158_v45 }
 0x10c   :  { %600 = vmatmul.mubr.bf16.vlgmr.msra.gmra.mrb[8].mxu0 %v405_v47  ;;  %848 = vmatprep.mubr.bf16.mxu1 %v405_v47 }
 0x10d   :  { %849 = vmatmul.mubr.bf16.vlgmr.msra.gmra.mrb[4].mxu1 %v406_v46  ;;  %609 = vmatprep.mubr.bf16.mxu0 %v919_v1 }
 0x114   :  { %610 = vmatmul.mubr.bf16.gmra.mrb[12].mxu0 %v406_v46 }
 0x1df   :  { %v601_v48 = vpop.f32.mrb[8].mxu0 }
 0x1e0   :  { %v603_v49 = vpop.f32.mrb[9].mxu0  ;;  %v850_v50 = vpop.f32.mrb[4].mxu1  ;;  %v669_v54 = vrot.slane %v601_v48, 7 }
 0x1e1   :  { %v605_v51 = vpop.f32.mrb[10].mxu0  ;;  %v654_v53 = vpop.f32.mrb[5].mxu1  ;;  %v687_v59 = vrot.slane %v850_v50, 1 }
 0x1e2   :  { %v670_v55 = vrot.slane %v605_v51, 7  ;;  %v685_v56 = vrot.slane %v654_v53, 1  ;;  %v607_v57 = vpop.f32.mrb[11].mxu0  ;;  %v851_v58 = vpop.f32.mrb[6].mxu1 }
 0x1e3   :  { %v688_v60 = vrot.slane %v851_v58, 1  ;;  %v657_v61 = vpop.f32.mrb[7].mxu1 }
 0x1e4   :  { %v675_v62 = vsel %vm364_vm0, %v669_v54, %v670_v55  ;;  %v686_v63 = vrot.slane %v657_v61, 1 }
 0x1e5   :  { %v682_v0 = vadd.f32 %v675_v62, %v607_v57  ;;  %v689_v1 = vsel %vm381_vm1, %v687_v59, %v688_v60  ;;  %v692_v2 = vsel %vm381_vm1, %v688_v60, %v685_v56 }
 0x1e6   :  { %v690_v3 = vsel %vm381_vm1, %v686_v63, %v687_v59  ;;  %v691_v4 = vsel %vm381_vm1, %v685_v56, %v686_v63  ;;  %v696_v22 = vsel %vm1139_vm5, %v692_v2, 0.0 }
 0x1e7   :  { %v694_v5 = vsel %vm1109_vm2, %v690_v3, 0.0  ;;  %v611_v8 = vpop.f32.mrb[12].mxu0 }
 0x1e8   :  { %v698_v9 = vadd.f32 %v694_v5, %v682_v0  ;;  %v671_v10 = vrot.slane %v611_v8, 7  ;;  %v613_v11 = vpop.f32.mrb[13].mxu0 }
 0x1e9   :  { %v615_v12 = vpop.f32.mrb[14].mxu0 }
 0x1ea   :  { %v709_v13 = vadd.f32 %v791_v7, %v698_v9  ;;  %v674_v14 = vsel %vm364_vm0, %v670_v55, %v671_v10  ;;  %v672_v15 = vrot.slane %v615_v12, 7  ;;  %v617_v16 = vpop.f32.mrb[15].mxu0 }
 0x1eb   :  { %v679_v17 = vsel %vm1127_vm3, %v674_v14, 0.0 }
 0x1ec   :  { %v717_v6 = vmax.f32 %v709_v13, 0.0  ;;  %v683_v18 = vadd.f32 %v679_v17, %v613_v11  ;;  %v676_v19 = vsel %vm364_vm0, %v672_v15, %v669_v54  ;;  %v673_v20 = vsel %vm364_vm0, %v671_v10, %v672_v15 }
 0x1ed   :  { %v677_v23 = vsel %vm1133_vm4, %v676_v19, 0.0  ;;  %v684_v24 = vadd.f32 %v673_v20, %v617_v16 }
 0x1ee   :  { %v721_v25 = vmin.f32 %v717_v6, 6.0  ;;  %v699_v27 = vadd.f32 %v689_v1, %v683_v18  ;;  %v681_v28 = vadd.f32 %v677_v23, %v603_v49 }
 0x1ef   :  { %v700_v29 = vadd.f32 %v696_v22, %v684_v24 }
 0x1f0   :  { %v725_v31 = vmul.f32 %v721_v25, %v713_v21  ;;  %v710_v32 = vadd.f32 %v791_v7, %v699_v27  ;;  %v697_v33 = vadd.f32 %v691_v4, %v681_v28 }
 0x1f1   :  { %v711_v34 = vadd.f32 %v791_v7, %v700_v29 }
 0x1f2   :  { %v729_v35 = vmul.f32 0.16666667, %v725_v31  ;;  %v718_v36 = vmax.f32 %v710_v32, 0.0  ;;  %v708_v52 = vadd.f32 %v791_v7, %v697_v33 }
 0x1f3   :  { %v719_v37 = vmax.f32 %v711_v34, 0.0 }
 0x1f4   :  { %733 = vst [vmem:[%s1211_s5 + $0x8] sm:$0xff] %v729_v35  ;;  %v722_v26 = vmin.f32 %v718_v36, 6.0  ;;  %v716_v39 = vmax.f32 %v708_v52, 0.0 }
 0x1f5   :  { %v723_v40 = vmin.f32 %v719_v37, 6.0 }
 0x1f6   :  { %v726_v44 = vmul.f32 %v722_v26, %v714_v38  ;;  %v720_v46 = vmin.f32 %v716_v39, 6.0 }
 0x1f7   :  { %v727_v47 = vmul.f32 %v723_v40, %v715_v30 }
 0x1f8   :  { %v730_v48 = vmul.f32 0.16666667, %v726_v44  ;;  %v724_v49 = vmul.f32 %v720_v46, %v712_v42 }
 0x1f9   :  { %v731_v50 = vmul.f32 0.16666667, %v727_v47 }
 0x1fa   :  { %734 = vst [vmem:[%s1211_s5 + $0x10] sm:$0xff] %v730_v48  ;;  %v728_v41 = vmul.f32 0.16666667, %v724_v49 }
 0x1fb   :  { %735 = vst [vmem:[%s1211_s5 + $0x18] sm:$0xff] %v731_v50 }
 0x1fc   :  { %732 = vst [vmem:[%s1211_s5] sm:$0xff] %v728_v41 }

</bundles_post_ra>
